<compile_context>
chip_gen: v7x
topology: tpu7x:2x2x1
jax: 0.10.0
libtpu: 0.0.40
codegen_flags: <defaults>
</compile_context>

<pallas_src>
import functools

import jax
import jax.numpy as jnp
from jax import lax
from jax.experimental import pallas as pl
from jax.experimental.pallas import tpu as pltpu

C_PAD = 128            # lane-padded channel width carried between units
N_OUT = 2 * C_PAD      # matmul output lanes: [conv (0:128) | residual (128:256)]


# ------------------------------ params -----------------------------------
def init_unit_params(key, dim_in, dim_out):
    """Deterministic init matching PyTorch Conv1d param shapes.

    cnn1.weight: (dim_out, dim_in, 3), cnn1.bias: (dim_out,)
    res.weight : (dim_out, dim_in, 1), res.bias : (dim_out,)
    """
    k1, k2, k3, k4 = jax.random.split(key, 4)
    bound3 = 1.0 / jnp.sqrt(jnp.float32(dim_in * 3))
    bound1 = 1.0 / jnp.sqrt(jnp.float32(dim_in * 1))
    w_cnn = jax.random.uniform(k1, (dim_out, dim_in, 3), jnp.float32, -bound3, bound3)
    b_cnn = jax.random.uniform(k2, (dim_out,), jnp.float32, -bound3, bound3)
    w_res = jax.random.uniform(k3, (dim_out, dim_in, 1), jnp.float32, -bound1, bound1)
    b_res = jax.random.uniform(k4, (dim_out,), jnp.float32, -bound1, bound1)
    return w_cnn, b_cnn, w_res, b_res


def prepare_params(params):
    """PyTorch-layout weights -> one packed-K (W bf16, B f32) pair per unit (run once).

    W (C_PAD, 2*C_PAD), packed contraction:
      rows [k*Cin:(k+1)*Cin], cols [0:Cout]           = conv tap k (k=0 -> x[l-1])
      rows [Cin:2*Cin],      cols [C_PAD:C_PAD+Cout]  = 1x1 residual (shares x[l] rows)
    B (1, 2*C_PAD) = [conv bias | residual bias], zeros elsewhere.
    NOTE: all lanes/cols beyond Cin/Cout MUST stay zero so the activation's padded
    lanes remain exactly zero between units (the lane-roll packing relies on it).
    """
    kparams = []
    for w_cnn, b_cnn, w_res, b_res in params:
        dim_out, dim_in, _ = w_cnn.shape
        assert 3 * dim_in <= C_PAD, "packed-K layout needs 3*Cin <= 128"
        assert dim_out <= C_PAD
        w3 = jnp.transpose(w_cnn, (2, 1, 0))           # (3, Cin, Cout)
        wres = jnp.transpose(w_res[:, :, 0], (1, 0))   # (Cin, Cout)
        W = jnp.zeros((C_PAD, N_OUT), jnp.float32)
        for k in range(3):
            W = W.at[k * dim_in:(k + 1) * dim_in, 0:dim_out].set(w3[k])
        W = W.at[dim_in:2 * dim_in, C_PAD:C_PAD + dim_out].set(wres)
        B = jnp.zeros((1, N_OUT), jnp.float32)
        B = B.at[0, 0:dim_out].set(b_cnn)
        B = B.at[0, C_PAD:C_PAD + dim_out].set(b_res)
        kparams.append((W.astype(jnp.bfloat16), B))
    return kparams


# ------------------------------ forward -----------------------------------
def _pick_seq_per_tile(n_seq, seq_len, target_rows=512):
    """Whole-sequence row tiles (multiple of L rows), ~target_rows, dividing N."""
    spt = max(1, min(n_seq, max(1, target_rows // max(1, seq_len))))
    while spt > 1 and (n_seq % spt != 0 or (spt * seq_len) % 8 != 0):
        spt -= 1
    if n_seq % spt != 0 or ((spt * seq_len) % 8 != 0 and spt != n_seq):
        spt = n_seq  # full-array tile is always a legal block shape
    return spt


def model_cnn_forward(x_ncl, kparams, cins, final_cout):
    """x_ncl: (N, Cin, L) like the PyTorch module. Returns (N, final_cout, L)."""
    n_seq, cin0, seq_len = x_ncl.shape
    n_units = len(kparams)
    m_rows = n_seq * seq_len

    # NCL -> (N*L, C_PAD): channels on lanes, zero-padded so padded lanes stay 0.
    x = jnp.transpose(x_ncl, (0, 2, 1)).reshape(m_rows, cin0).astype(jnp.float32)
    x = jnp.pad(x, ((0, 0), (0, C_PAD - cin0)))

    spt = _pick_seq_per_tile(n_seq, seq_len)
    tile_m = spt * seq_len
    grid = (m_rows // tile_m,)

    def kernel(x_ref, *wb_and_out):
        out_ref = wb_and_out[-1]
        wb = wb_and_out[:-1]

        h = x_ref[...]                                            # (tile_m, C_PAD) f32
        # Sequence-boundary masks rebuilt in-kernel (no HBM mask traffic).
        row = lax.broadcasted_iota(jnp.int32, (tile_m, C_PAD), 0)
        pos = row % seq_len
        not_first = pos != 0
        not_last = pos != (seq_len - 1)

        for u in range(n_units):
            w = wb[2 * u][...]                                    # (C_PAD, N_OUT) bf16
            b = wb[2 * u + 1][...]                                # (1, N_OUT) f32
            cin = cins[u]

            # Shifted copies for Conv1d(k=3, padding=1); jnp.where zeroes rows that
            # wrapped across a sequence (tiles hold whole sequences, so tile-edge
            # wrap is also a sequence edge and gets masked).
            h_m1 = jnp.where(not_first, pltpu.roll(h, shift=1, axis=0), 0.0)
            h_p1 = jnp.where(not_last, pltpu.roll(h, shift=tile_m - 1, axis=0), 0.0)

            # Packed-K input: lanes [0:cin]=x[l-1], [cin:2cin]=x[l], [2cin:3cin]=x[l+1].
            # Lanes >= cin of h / h_m1 / h_p1 are exactly zero, so roll wrap adds 0.
            xp = (h_m1
                  + pltpu.roll(h, shift=cin, axis=1)
                  + pltpu.roll(h_p1, shift=2 * cin, axis=1))

            r = jnp.dot(xp.astype(jnp.bfloat16), w,
                        preferred_element_type=jnp.float32) + b   # (tile_m, N_OUT) f32
            h = r[:, C_PAD:] + jnp.maximum(r[:, :C_PAD], 0.0)     # res + relu(conv)

        out_ref[...] = h

    in_specs = [pl.BlockSpec((tile_m, C_PAD), lambda i: (i, 0))]
    args = [x]
    for w, b in kparams:
        in_specs.append(pl.BlockSpec((C_PAD, N_OUT), lambda i: (0, 0)))  # VMEM-resident
        in_specs.append(pl.BlockSpec((1, N_OUT), lambda i: (0, 0)))      # VMEM-resident
        args.extend((w, b))

    w_bytes = sum(int(w.size) * w.dtype.itemsize + int(b.size) * b.dtype.itemsize
                  for w, b in kparams)
    cost = pl.CostEstimate(
        flops=2 * m_rows * C_PAD * N_OUT * n_units,
        transcendentals=0,
        bytes_accessed=2 * m_rows * C_PAD * 4 + w_bytes)

    out = pl.pallas_call(
        kernel,
        out_shape=jax.ShapeDtypeStruct((m_rows, C_PAD), jnp.float32),
        grid=grid,
        in_specs=in_specs,
        out_specs=pl.BlockSpec((tile_m, C_PAD), lambda i: (i, 0)),
        compiler_params=pltpu.CompilerParams(
            dimension_semantics=("parallel",),
            vmem_limit_bytes=32 * 1024 * 1024),
        cost_estimate=cost,
    )(*args)

    out = out[:, :final_cout].reshape(n_seq, seq_len, final_cout)
    return jnp.transpose(out, (0, 2, 1))                          # -> (N, Cout, L)


# ---------------- plain-JAX reference (correctness check only) ------------
def ref_unit(x_ncl, w_cnn, b_cnn, w_res, b_res):
    dn = ("NCH", "OIH", "NCH")
    y = lax.conv_general_dilated(x_ncl, w_cnn, window_strides=(1,),
                                 padding=((1, 1),), dimension_numbers=dn)
    y = jnp.maximum(y + b_cnn[None, :, None], 0.0)
    r = lax.conv_general_dilated(x_ncl, w_res, window_strides=(1,),
                                 padding=((0, 0),), dimension_numbers=dn)
    r = r + b_res[None, :, None]
    return r + y


def ref_forward(x_ncl, params):
    x = x_ncl
    for p in params:
        x = ref_unit(x, *p)
    return x


if __name__ == "__main__":
    key = jax.random.PRNGKey(0)
    k_in, k1, k2, k3, k4 = jax.random.split(key, 5)

    # Small shapes consistent with model_CNN: input has 1 channel.
    N, C, L = 2, 1, 16
    x = jax.random.normal(k_in, (N, C, L), dtype=jnp.float32)

    dims = [(1, 16), (16, 32), (32, 16), (16, 3)]
    params = [init_unit_params(k, di, do)
              for k, (di, do) in zip([k1, k2, k3, k4], dims)]

    # Weight layout conversion (packed-K, bf16) hoisted out of the forward path.
    kparams = prepare_params(params)

    fwd = jax.jit(functools.partial(
        model_cnn_forward,
        cins=tuple(di for di, _ in dims),
        final_cout=dims[-1][1]))
    out = jax.block_until_ready(fwd(x, kparams))

    ref = ref_forward(x, params)
    assert out.shape == (N, dims[-1][1], L), out.shape
    max_err = float(jnp.max(jnp.abs(out - ref)))
    # bf16 matmul operands with f32 accumulation -> small rounding error allowed.
    assert jnp.allclose(out, ref, atol=3e-2, rtol=3e-2), f"mismatch vs reference: {max_err}"

    print("KERNEL_OK")
</pallas_src>

<mosaic_0001>
module attributes {stable_mosaic.version = 11 : i64} {
  func.func @kernel(%arg0: i32, %arg1: memref<32x128xf32, #tpu.memory_space<vmem>>, %arg2: memref<128x256xbf16, #tpu.memory_space<vmem>>, %arg3: memref<1x256xf32, #tpu.memory_space<vmem>>, %arg4: memref<128x256xbf16, #tpu.memory_space<vmem>>, %arg5: memref<1x256xf32, #tpu.memory_space<vmem>>, %arg6: memref<128x256xbf16, #tpu.memory_space<vmem>>, %arg7: memref<1x256xf32, #tpu.memory_space<vmem>>, %arg8: memref<128x256xbf16, #tpu.memory_space<vmem>>, %arg9: memref<1x256xf32, #tpu.memory_space<vmem>>, %arg10: memref<32x128xf32, #tpu.memory_space<vmem>>) attributes {dimension_semantics = [#tpu.dimension_semantics<parallel>], iteration_bounds = array<i64: 1>, scalar_prefetch = 0 : i64, scratch_operands = 0 : i64, tpu.core_type = #tpu.core_type<tc>, window_params = [{transform_indices = @transform_0, window_bounds = array<i64: 32, 128>}, {pipeline_mode = #tpu.pipeline_mode<synchronous>, transform_indices = @transform_1, window_bounds = array<i64: 128, 256>}, {pipeline_mode = #tpu.pipeline_mode<synchronous>, transform_indices = @transform_2, window_bounds = array<i64: 1, 256>}, {pipeline_mode = #tpu.pipeline_mode<synchronous>, transform_indices = @transform_3, window_bounds = array<i64: 128, 256>}, {pipeline_mode = #tpu.pipeline_mode<synchronous>, transform_indices = @transform_4, window_bounds = array<i64: 1, 256>}, {pipeline_mode = #tpu.pipeline_mode<synchronous>, transform_indices = @transform_5, window_bounds = array<i64: 128, 256>}, {pipeline_mode = #tpu.pipeline_mode<synchronous>, transform_indices = @transform_6, window_bounds = array<i64: 1, 256>}, {pipeline_mode = #tpu.pipeline_mode<synchronous>, transform_indices = @transform_7, window_bounds = array<i64: 128, 256>}, {pipeline_mode = #tpu.pipeline_mode<synchronous>, transform_indices = @transform_8, window_bounds = array<i64: 1, 256>}, {transform_indices = @transform_9, window_bounds = array<i64: 32, 128>}]} {
    %c0 = arith.constant 0 : index
    %c0_0 = arith.constant 0 : index
    %0 = vector.load %arg1[%c0, %c0_0] : memref<32x128xf32, #tpu.memory_space<vmem>>, vector<32x128xf32>
    %1 = tpu.iota {dimensions = array<i32: 0>} : vector<32x128xi32>
    %c16_i32 = arith.constant 16 : i32
    %c0_i32 = arith.constant 0 : i32
    %2 = arith.cmpi eq, %c16_i32, %c0_i32 : i32
    %c1_i32 = arith.constant 1 : i32
    %3 = arith.select %2, %c1_i32, %c16_i32 : i32
    %4 = vector.broadcast %3 : i32 to vector<32x128xi32>
    %5 = arith.remsi %1, %4 : vector<32x128xi32>
    %c0_i32_1 = arith.constant 0 : i32
    %6 = vector.broadcast %c0_i32_1 : i32 to vector<32x128xi32>
    %7 = arith.cmpi ne, %5, %6 : vector<32x128xi32>
    %c0_i32_2 = arith.constant 0 : i32
    %8 = vector.broadcast %c0_i32_2 : i32 to vector<32x128xi32>
    %9 = arith.cmpi slt, %5, %8 : vector<32x128xi32>
    %c0_i32_3 = arith.constant 0 : i32
    %10 = arith.cmpi slt, %3, %c0_i32_3 : i32
    %11 = vector.broadcast %10 : i1 to vector<32x128xi1>
    %12 = vector.broadcast %11 : vector<32x128xi1> to vector<32x128xi1>
    %13 = arith.xori %9, %12 : vector<32x128xi1>
    %14 = arith.andi %13, %7 : vector<32x128xi1>
    %15 = vector.broadcast %3 : i32 to vector<32x128xi32>
    %16 = arith.addi %5, %15 : vector<32x128xi32>
    %17 = arith.select %14, %16, %5 : vector<32x128xi1>, vector<32x128xi32>
    %c0_i32_4 = arith.constant 0 : i32
    %18 = vector.broadcast %c0_i32_4 : i32 to vector<32x128xi32>
    %19 = arith.cmpi ne, %17, %18 : vector<32x128xi32>
    %c15_i32 = arith.constant 15 : i32
    %20 = vector.broadcast %c15_i32 : i32 to vector<32x128xi32>
    %21 = arith.cmpi ne, %17, %20 : vector<32x128xi32>
    %c0_5 = arith.constant 0 : index
    %c0_6 = arith.constant 0 : index
    %22 = vector.load %arg2[%c0_5, %c0_6] : memref<128x256xbf16, #tpu.memory_space<vmem>>, vector<128x256xbf16>
    %c0_7 = arith.constant 0 : index
    %c0_8 = arith.constant 0 : index
    %23 = vector.load %arg3[%c0_7, %c0_8] : memref<1x256xf32, #tpu.memory_space<vmem>>, vector<1x256xf32>
    %c1_i32_9 = arith.constant 1 : i32
    %24 = tpu.dynamic_rotate %0 by %c1_i32_9 dim 0 : vector<32x128xf32>, i32 -> vector<32x128xf32>
    %cst = arith.constant 0.000000e+00 : f32
    %25 = vector.broadcast %cst : f32 to vector<32x128xf32>
    %26 = arith.select %19, %24, %25 : vector<32x128xi1>, vector<32x128xf32>
    %c31_i32 = arith.constant 31 : i32
    %27 = tpu.dynamic_rotate %0 by %c31_i32 dim 0 : vector<32x128xf32>, i32 -> vector<32x128xf32>
    %cst_10 = arith.constant 0.000000e+00 : f32
    %28 = vector.broadcast %cst_10 : f32 to vector<32x128xf32>
    %29 = arith.select %21, %27, %28 : vector<32x128xi1>, vector<32x128xf32>
    %c1_i32_11 = arith.constant 1 : i32
    %30 = tpu.dynamic_rotate %0 by %c1_i32_11 dim 1 : vector<32x128xf32>, i32 -> vector<32x128xf32>
    %31 = arith.addf %26, %30 : vector<32x128xf32>
    %c2_i32 = arith.constant 2 : i32
    %32 = tpu.dynamic_rotate %29 by %c2_i32 dim 1 : vector<32x128xf32>, i32 -> vector<32x128xf32>
    %33 = arith.addf %31, %32 : vector<32x128xf32>
    %34 = arith.truncf %33 : vector<32x128xf32> to vector<32x128xbf16>
    %cst_12 = arith.constant dense<0.000000e+00> : vector<32x256xf32>
    %35 = tpu.matmul %34, %22, %cst_12 {dimension_numbers = #tpu.dot_dimension_numbers<[1], [0], [0], [1], [0, 0, 1, 1], [], []>} : vector<32x128xbf16>, vector<128x256xbf16>, vector<32x256xf32> -> vector<32x256xf32>
    %36 = vector.broadcast %23 : vector<1x256xf32> to vector<32x256xf32>
    %37 = arith.addf %35, %36 : vector<32x256xf32>
    %38 = vector.extract_strided_slice %37 {offsets = [0, 128], sizes = [32, 128], strides = [1, 1]} : vector<32x256xf32> to vector<32x128xf32>
    %39 = vector.extract_strided_slice %37 {offsets = [0, 0], sizes = [32, 128], strides = [1, 1]} : vector<32x256xf32> to vector<32x128xf32>
    %cst_13 = arith.constant 0.000000e+00 : f32
    %40 = vector.broadcast %cst_13 : f32 to vector<32x128xf32>
    %41 = arith.maximumf %39, %40 : vector<32x128xf32>
    %42 = arith.addf %38, %41 : vector<32x128xf32>
    %c0_14 = arith.constant 0 : index
    %c0_15 = arith.constant 0 : index
    %43 = vector.load %arg4[%c0_14, %c0_15] : memref<128x256xbf16, #tpu.memory_space<vmem>>, vector<128x256xbf16>
    %c0_16 = arith.constant 0 : index
    %c0_17 = arith.constant 0 : index
    %44 = vector.load %arg5[%c0_16, %c0_17] : memref<1x256xf32, #tpu.memory_space<vmem>>, vector<1x256xf32>
    %c1_i32_18 = arith.constant 1 : i32
    %45 = tpu.dynamic_rotate %42 by %c1_i32_18 dim 0 : vector<32x128xf32>, i32 -> vector<32x128xf32>
    %cst_19 = arith.constant 0.000000e+00 : f32
    %46 = vector.broadcast %cst_19 : f32 to vector<32x128xf32>
    %47 = arith.select %19, %45, %46 : vector<32x128xi1>, vector<32x128xf32>
    %c31_i32_20 = arith.constant 31 : i32
    %48 = tpu.dynamic_rotate %42 by %c31_i32_20 dim 0 : vector<32x128xf32>, i32 -> vector<32x128xf32>
    %cst_21 = arith.constant 0.000000e+00 : f32
    %49 = vector.broadcast %cst_21 : f32 to vector<32x128xf32>
    %50 = arith.select %21, %48, %49 : vector<32x128xi1>, vector<32x128xf32>
    %c16_i32_22 = arith.constant 16 : i32
    %51 = tpu.dynamic_rotate %42 by %c16_i32_22 dim 1 : vector<32x128xf32>, i32 -> vector<32x128xf32>
    %52 = arith.addf %47, %51 : vector<32x128xf32>
    %c32_i32 = arith.constant 32 : i32
    %53 = tpu.dynamic_rotate %50 by %c32_i32 dim 1 : vector<32x128xf32>, i32 -> vector<32x128xf32>
    %54 = arith.addf %52, %53 : vector<32x128xf32>
    %55 = arith.truncf %54 : vector<32x128xf32> to vector<32x128xbf16>
    %cst_23 = arith.constant dense<0.000000e+00> : vector<32x256xf32>
    %56 = tpu.matmul %55, %43, %cst_23 {dimension_numbers = #tpu.dot_dimension_numbers<[1], [0], [0], [1], [0, 0, 1, 1], [], []>} : vector<32x128xbf16>, vector<128x256xbf16>, vector<32x256xf32> -> vector<32x256xf32>
    %57 = vector.broadcast %44 : vector<1x256xf32> to vector<32x256xf32>
    %58 = arith.addf %56, %57 : vector<32x256xf32>
    %59 = vector.extract_strided_slice %58 {offsets = [0, 128], sizes = [32, 128], strides = [1, 1]} : vector<32x256xf32> to vector<32x128xf32>
    %60 = vector.extract_strided_slice %58 {offsets = [0, 0], sizes = [32, 128], strides = [1, 1]} : vector<32x256xf32> to vector<32x128xf32>
    %cst_24 = arith.constant 0.000000e+00 : f32
    %61 = vector.broadcast %cst_24 : f32 to vector<32x128xf32>
    %62 = arith.maximumf %60, %61 : vector<32x128xf32>
    %63 = arith.addf %59, %62 : vector<32x128xf32>
    %c0_25 = arith.constant 0 : index
    %c0_26 = arith.constant 0 : index
    %64 = vector.load %arg6[%c0_25, %c0_26] : memref<128x256xbf16, #tpu.memory_space<vmem>>, vector<128x256xbf16>
    %c0_27 = arith.constant 0 : index
    %c0_28 = arith.constant 0 : index
    %65 = vector.load %arg7[%c0_27, %c0_28] : memref<1x256xf32, #tpu.memory_space<vmem>>, vector<1x256xf32>
    %c1_i32_29 = arith.constant 1 : i32
    %66 = tpu.dynamic_rotate %63 by %c1_i32_29 dim 0 : vector<32x128xf32>, i32 -> vector<32x128xf32>
    %cst_30 = arith.constant 0.000000e+00 : f32
    %67 = vector.broadcast %cst_30 : f32 to vector<32x128xf32>
    %68 = arith.select %19, %66, %67 : vector<32x128xi1>, vector<32x128xf32>
    %c31_i32_31 = arith.constant 31 : i32
    %69 = tpu.dynamic_rotate %63 by %c31_i32_31 dim 0 : vector<32x128xf32>, i32 -> vector<32x128xf32>
    %cst_32 = arith.constant 0.000000e+00 : f32
    %70 = vector.broadcast %cst_32 : f32 to vector<32x128xf32>
    %71 = arith.select %21, %69, %70 : vector<32x128xi1>, vector<32x128xf32>
    %c32_i32_33 = arith.constant 32 : i32
    %72 = tpu.dynamic_rotate %63 by %c32_i32_33 dim 1 : vector<32x128xf32>, i32 -> vector<32x128xf32>
    %73 = arith.addf %68, %72 : vector<32x128xf32>
    %c64_i32 = arith.constant 64 : i32
    %74 = tpu.dynamic_rotate %71 by %c64_i32 dim 1 : vector<32x128xf32>, i32 -> vector<32x128xf32>
    %75 = arith.addf %73, %74 : vector<32x128xf32>
    %76 = arith.truncf %75 : vector<32x128xf32> to vector<32x128xbf16>
    %cst_34 = arith.constant dense<0.000000e+00> : vector<32x256xf32>
    %77 = tpu.matmul %76, %64, %cst_34 {dimension_numbers = #tpu.dot_dimension_numbers<[1], [0], [0], [1], [0, 0, 1, 1], [], []>} : vector<32x128xbf16>, vector<128x256xbf16>, vector<32x256xf32> -> vector<32x256xf32>
    %78 = vector.broadcast %65 : vector<1x256xf32> to vector<32x256xf32>
    %79 = arith.addf %77, %78 : vector<32x256xf32>
    %80 = vector.extract_strided_slice %79 {offsets = [0, 128], sizes = [32, 128], strides = [1, 1]} : vector<32x256xf32> to vector<32x128xf32>
    %81 = vector.extract_strided_slice %79 {offsets = [0, 0], sizes = [32, 128], strides = [1, 1]} : vector<32x256xf32> to vector<32x128xf32>
    %cst_35 = arith.constant 0.000000e+00 : f32
    %82 = vector.broadcast %cst_35 : f32 to vector<32x128xf32>
    %83 = arith.maximumf %81, %82 : vector<32x128xf32>
    %84 = arith.addf %80, %83 : vector<32x128xf32>
    %c0_36 = arith.constant 0 : index
    %c0_37 = arith.constant 0 : index
    %85 = vector.load %arg8[%c0_36, %c0_37] : memref<128x256xbf16, #tpu.memory_space<vmem>>, vector<128x256xbf16>
    %c0_38 = arith.constant 0 : index
    %c0_39 = arith.constant 0 : index
    %86 = vector.load %arg9[%c0_38, %c0_39] : memref<1x256xf32, #tpu.memory_space<vmem>>, vector<1x256xf32>
    %c1_i32_40 = arith.constant 1 : i32
    %87 = tpu.dynamic_rotate %84 by %c1_i32_40 dim 0 : vector<32x128xf32>, i32 -> vector<32x128xf32>
    %cst_41 = arith.constant 0.000000e+00 : f32
    %88 = vector.broadcast %cst_41 : f32 to vector<32x128xf32>
    %89 = arith.select %19, %87, %88 : vector<32x128xi1>, vector<32x128xf32>
    %c31_i32_42 = arith.constant 31 : i32
    %90 = tpu.dynamic_rotate %84 by %c31_i32_42 dim 0 : vector<32x128xf32>, i32 -> vector<32x128xf32>
    %cst_43 = arith.constant 0.000000e+00 : f32
    %91 = vector.broadcast %cst_43 : f32 to vector<32x128xf32>
    %92 = arith.select %21, %90, %91 : vector<32x128xi1>, vector<32x128xf32>
    %c16_i32_44 = arith.constant 16 : i32
    %93 = tpu.dynamic_rotate %84 by %c16_i32_44 dim 1 : vector<32x128xf32>, i32 -> vector<32x128xf32>
    %94 = arith.addf %89, %93 : vector<32x128xf32>
    %c32_i32_45 = arith.constant 32 : i32
    %95 = tpu.dynamic_rotate %92 by %c32_i32_45 dim 1 : vector<32x128xf32>, i32 -> vector<32x128xf32>
    %96 = arith.addf %94, %95 : vector<32x128xf32>
    %97 = arith.truncf %96 : vector<32x128xf32> to vector<32x128xbf16>
    %cst_46 = arith.constant dense<0.000000e+00> : vector<32x256xf32>
    %98 = tpu.matmul %97, %85, %cst_46 {dimension_numbers = #tpu.dot_dimension_numbers<[1], [0], [0], [1], [0, 0, 1, 1], [], []>} : vector<32x128xbf16>, vector<128x256xbf16>, vector<32x256xf32> -> vector<32x256xf32>
    %99 = vector.broadcast %86 : vector<1x256xf32> to vector<32x256xf32>
    %100 = arith.addf %98, %99 : vector<32x256xf32>
    %101 = vector.extract_strided_slice %100 {offsets = [0, 128], sizes = [32, 128], strides = [1, 1]} : vector<32x256xf32> to vector<32x128xf32>
    %102 = vector.extract_strided_slice %100 {offsets = [0, 0], sizes = [32, 128], strides = [1, 1]} : vector<32x256xf32> to vector<32x128xf32>
    %cst_47 = arith.constant 0.000000e+00 : f32
    %103 = vector.broadcast %cst_47 : f32 to vector<32x128xf32>
    %104 = arith.maximumf %102, %103 : vector<32x128xf32>
    %105 = arith.addf %101, %104 : vector<32x128xf32>
    %c0_48 = arith.constant 0 : index
    %c0_49 = arith.constant 0 : index
    %106 = vector.load %arg10[%c0_48, %c0_49] : memref<32x128xf32, #tpu.memory_space<vmem>>, vector<32x128xf32>
    tpu.vector_store %arg10[%c0_48, %c0_49], %105 {strides = array<i32>} : memref<32x128xf32, #tpu.memory_space<vmem>>, vector<32x128xf32>,
    return
  }
  func.func @transform_0(%arg0: i32) -> (i32, i32) {
    %c0_i32 = arith.constant 0 : i32
    %c0_i32_0 = arith.constant 0 : i32
    return %arg0, %c0_i32 : i32, i32
  }
  func.func @transform_1(%arg0: i32) -> (i32, i32) {
    %c0_i32 = arith.constant 0 : i32
    %c0_i32_0 = arith.constant 0 : i32
    %c0_i32_1 = arith.constant 0 : i32
    return %c0_i32, %c0_i32_0 : i32, i32
  }
  func.func @transform_2(%arg0: i32) -> (i32, i32) {
    %c0_i32 = arith.constant 0 : i32
    %c0_i32_0 = arith.constant 0 : i32
    %c0_i32_1 = arith.constant 0 : i32
    return %c0_i32, %c0_i32_0 : i32, i32
  }
  func.func @transform_3(%arg0: i32) -> (i32, i32) {
    %c0_i32 = arith.constant 0 : i32
    %c0_i32_0 = arith.constant 0 : i32
    %c0_i32_1 = arith.constant 0 : i32
    return %c0_i32, %c0_i32_0 : i32, i32
  }
  func.func @transform_4(%arg0: i32) -> (i32, i32) {
    %c0_i32 = arith.constant 0 : i32
    %c0_i32_0 = arith.constant 0 : i32
    %c0_i32_1 = arith.constant 0 : i32
    return %c0_i32, %c0_i32_0 : i32, i32
  }
  func.func @transform_5(%arg0: i32) -> (i32, i32) {
    %c0_i32 = arith.constant 0 : i32
    %c0_i32_0 = arith.constant 0 : i32
    %c0_i32_1 = arith.constant 0 : i32
    return %c0_i32, %c0_i32_0 : i32, i32
  }
  func.func @transform_6(%arg0: i32) -> (i32, i32) {
    %c0_i32 = arith.constant 0 : i32
    %c0_i32_0 = arith.constant 0 : i32
    %c0_i32_1 = arith.constant 0 : i32
    return %c0_i32, %c0_i32_0 : i32, i32
  }
  func.func @transform_7(%arg0: i32) -> (i32, i32) {
    %c0_i32 = arith.constant 0 : i32
    %c0_i32_0 = arith.constant 0 : i32
    %c0_i32_1 = arith.constant 0 : i32
    return %c0_i32, %c0_i32_0 : i32, i32
  }
  func.func @transform_8(%arg0: i32) -> (i32, i32) {
    %c0_i32 = arith.constant 0 : i32
    %c0_i32_0 = arith.constant 0 : i32
    %c0_i32_1 = arith.constant 0 : i32
    return %c0_i32, %c0_i32_0 : i32, i32
  }
  func.func @transform_9(%arg0: i32) -> (i32, i32) {
    %c0_i32 = arith.constant 0 : i32
    %c0_i32_0 = arith.constant 0 : i32
    return %arg0, %c0_i32 : i32, i32
  }
}

</mosaic_0001>

<bundles_post_ra>
// kernel: model_cnn_forward.1
= control target key start
LH: loop header
LB: loop body
LE: loop exit
PB: predicated region body
PF: predicated region fallthrough
CT: control target
= control target key end

     0   :  { %14 = vsyncpa [#allocation3], 0  ;;  %s1635_s0 = inlined_call_operand.vmem [shape: f32[32,128], index: 0, kind: input, shape index: {}]   ;;  %s1636_s1 = inlined_call_operand.hbm [shape: bf16[128,256], index: 1, kind: input, shape index: {}]   ;;  %s1637_s2 = inlined_call_operand.vmem [shape: f32[1,256], index: 2, kind: input, shape index: {}]   ;;  %s1638_s3 = inlined_call_operand.hbm [shape: bf16[128,256], index: 3, kind: input, shape index: {}]   ;;  %s1639_s4 = inlined_call_operand.vmem [shape: f32[1,256], index: 4, kind: input, shape index: {}]   ;;  %s1640_s5 = inlined_call_operand.hbm [shape: bf16[128,256], index: 5, kind: input, shape index: {}]   ;;  %s1641_s6 = inlined_call_operand.vmem [shape: f32[1,256], index: 6, kind: input, shape index: {}]   ;;  %s1642_s7 = inlined_call_operand.vmem [shape: bf16[128,256], index: 7, kind: input, shape index: {}]   ;;  %s1643_s8 = inlined_call_operand.vmem [shape: f32[1,256], index: 8, kind: input, shape index: {}]   ;;  %s1644_s9 = inlined_call_operand.vmem [shape: f32[32,128], index: 9, kind: output, shape index: {}]  }
   0x1   :  { %15 = vsyncpa [#allocation5], 0  ;;  %s1268_s30 = smov [#allocation4]   ;;  %s1269_s11 = smov [#allocation2]  }
   0x2   :  { %s37_s10 = sshll.u32 %s1268_s30, 4  ;;  %s23_s12 = sshll.u32 %s1269_s11, 4  ;;  %s38_s10 = int_to_ptr.vmem [resolvable:$true] %s37_s10  ;;  %s1329_s12 = int_to_ptr.vmem [resolvable:$true] %s23_s12 }
   0x3   :  { %s1198_s15 = scalar_lea.hbm %s1638_s3, 2048 }
   0x4   :  { %p1199_p0 = scmp.ne.s32.totalorder %s1638_s3, %s1198_s15  ;;  %p1202_p1 = scmp.lt.u32.totalorder %s1198_s15, %s1638_s3 }
   0x6   :  { %p1204_p2 = pnand %p1202_p1, %p1199_p0 }
   0x8   :  { %1207 = shalt.err (!%p1204_p2)
}
   0x9   :  { %s1208_s20 = scalar_lea.vmem %s38_s10, 2048  ;;  %p1213_p4 = scmp.lt.s32.totalorder %s38_s10, %s38_s10 }
   0xa   :  { %p1209_p3 = scmp.ne.s32.totalorder %s38_s10, %s1208_s20  ;;  %p1214_p5 = scmp.lt.s32.totalorder %s1208_s20, %s1208_s20 }
   0xc   :  { %p1215_p6 = por %p1214_p5, %p1213_p4 }
   0xe   :  { %p1216_p7 = pnand %p1215_p6, %p1209_p3 }
  0x10   :  { %1219 = shalt.err (!%p1216_p7)
}
  0x11   :  { %s1270_s21 = smov 128   ;;  %s1271_s22 = smov 8  }
  0x12   :  { %43 = dma.hbm_to_vmem [thread:$0]  %s1638_s3, 2048, %s38_s10, [#allocation5], %s1270_s21, %s1270_s21, %s1271_s22  }
  0x13   :  { %s1220_s27 = scalar_lea.hbm %s1636_s1, 2048 }
  0x14   :  { %p1221_p8 = scmp.ne.s32.totalorder %s1636_s1, %s1220_s27  ;;  %p1224_p9 = scmp.lt.u32.totalorder %s1220_s27, %s1636_s1 }
  0x16   :  { %p1226_p10 = pnand %p1224_p9, %p1221_p8 }
  0x18   :  { %1229 = shalt.err (!%p1226_p10)
}
  0x19   :  { %s1230_s13 = scalar_lea.vmem %s1329_s12, 2048  ;;  %p1235_p12 = scmp.lt.s32.totalorder %s1329_s12, %s1329_s12 }
  0x1a   :  { %p1231_p11 = scmp.ne.s32.totalorder %s1329_s12, %s1230_s13  ;;  %p1236_p13 = scmp.lt.s32.totalorder %s1230_s13, %s1230_s13 }
  0x1c   :  { %p1237_p0 = por %p1236_p13, %p1235_p12 }
  0x1e   :  { %p1238_p1 = pnand %p1237_p0, %p1231_p11 }
  0x20   :  { %1241 = shalt.err (!%p1238_p1)
}
  0x21   :  { %29 = dma.hbm_to_vmem [thread:$0]  %s1636_s1, 2048, %s1329_s12, [#allocation3], %s1270_s21, %s1270_s21, %s1271_s22  }
  0x22   :  { %s1272_s14 = smov [#allocation6]   ;;  %s1242_s18 = scalar_lea.hbm %s1640_s5, 2048 }
  0x23   :  { %s51_s15 = sshll.u32 %s1272_s14, 4  ;;  %p1243_p2 = scmp.ne.s32.totalorder %s1640_s5, %s1242_s18  ;;  %s52_s15 = int_to_ptr.vmem [resolvable:$true] %s51_s15 }
  0x24   :  { %p1246_p3 = scmp.lt.u32.totalorder %s1242_s18, %s1640_s5 }
  0x26   :  { %p1248_p4 = pnand %p1246_p3, %p1243_p2 }
  0x28   :  { %1251 = shalt.err (!%p1248_p4)
}
  0x29   :  { %s1252_s25 = scalar_lea.vmem %s52_s15, 2048  ;;  %p1257_p6 = scmp.lt.s32.totalorder %s52_s15, %s52_s15 }
  0x2a   :  { %p1253_p5 = scmp.ne.s32.totalorder %s52_s15, %s1252_s25  ;;  %p1258_p7 = scmp.lt.s32.totalorder %s1252_s25, %s1252_s25 }
  0x2c   :  { %p1259_p8 = por %p1258_p7, %p1257_p6 }
  0x2e   :  { %p1260_p9 = pnand %p1259_p8, %p1253_p5 }
  0x30   :  { %1263 = shalt.err (!%p1260_p9)
}
  0x31   :  { %57 = dma.hbm_to_vmem [thread:$0]  %s1640_s5, 2048, %s52_s15, [#allocation5], %s1270_s21, %s1270_s21, %s1271_s22  }
  0x32   :  { %1264 = dma.done.wait [#allocation3], 2048  }
  0x33   :  { %1265 = vsyncadd [#allocation3], 4294965248 }
  0x34   :  { %1266 = dma.done.wait [#allocation5], 4096  }
  0x35   :  { %1267 = vsyncadd [#allocation5], 4294963200  ;;  %v78_v0 = vlaneseq  ;;  %v1273_v4 = vmov 0   ;;  %v74_v5 = vld [vmem:[%s1635_s0] sm:$0xff]  ;;  %v75_v6 = vld [vmem:[%s1635_s0 + $0x8] sm:$0xff]  ;;  %s1274_s29 = smov 1  }
  0x36   :  { %331 = vmatprep.mubr.bf16.mxu0 %v1273_v4  ;;  %550 = vmatprep.mubr.bf16.mxu1 %v1273_v4  ;;  %v76_v7 = vld [vmem:[%s1635_s0 + $0x10] sm:$0xff]  ;;  %v156_v8 = vrot.slane %v74_v5, 7  ;;  %v169_v9 = vrot.slane %v74_v5, 1  ;;  %v170_v10 = vrot.slane %v75_v6, 1  ;;  %v77_v11 = vld [vmem:[%s1635_s0 + $0x18] sm:$0xff]  ;;  %v157_v19 = vrot.slane %v75_v6, 7 }
  0x37   :  { %v1381_v1 = vshrl.u32 %v78_v0, 7  ;;  %182 = vrot.lane.b32.xlu0 %v74_v5, %s1274_s29  ;;  %v171_v13 = vrot.slane %v76_v7, 1  ;;  %v159_v14 = vrot.slane %v77_v11, 7  ;;  %v1102_v17 = vld [vmem:[#allocation2 + $0x4] ss:$8 sps:$4 sm:$0xff]   ;;  %s1275_s13 = smov 2  }
  0x38   :  { %v1104_v18 = vld [vmem:[#allocation2] ss:$8 sps:$4 sm:$0xff]   ;;  %v1105_v21 = vld [vmem:[#allocation2 + $0x14] ss:$8 sps:$4 sm:$0xff]   ;;  %299 = vmatprep.subr.bf16.mxu0 %v1102_v17  ;;  %v172_v25 = vrot.slane %v77_v11, 1  ;;  %v158_v29 = vrot.slane %v76_v7, 7 }
  0x39   :  { %v80_v2 = vadd.s32 8, %v1381_v1  ;;  %vm173_vm0 = vcmp.lt.s32.totalorder %v1381_v1, 7  ;;  %vm160_vm1 = vcmp.lt.s32.totalorder %v1381_v1, 1  ;;  %v82_v15 = vadd.s32 24, %v1381_v1  ;;  %300 = vmatpush1.bf16.msra.mxu0 %v1104_v18  ;;  %v1107_v27 = vld [vmem:[#allocation2 + $0x10] ss:$8 sps:$4 sm:$0xff]  }
  0x3a   :  { %v176_v16 = vsel %vm173_vm0, %v169_v9, %v170_v10  ;;  %v175_v20 = vsel %vm173_vm0, %v170_v10, %v171_v13  ;;  %v164_v22 = vsel %vm160_vm1, %v159_v14, %v156_v8  ;;  %v163_v24 = vsel %vm160_vm1, %v156_v8, %v157_v19  ;;  %301 = vmatprep.subr.bf16.mxu0 %v1105_v21  ;;  %v1108_v28 = vld [vmem:[#allocation2 + $0x24] ss:$8 sps:$4 sm:$0xff]   ;;  %v1110_v35 = vld [vmem:[#allocation2 + $0x20] ss:$8 sps:$4 sm:$0xff]   ;;  %v1111_v36 = vld [vmem:[#allocation2 + $0x34] ss:$8 sps:$4 sm:$0xff]  }
  0x3b   :  { %v94_v3 = vand.u32 15, %v80_v2  ;;  %194 = vrot.lane.b32.xlu1 %v176_v16, %s1275_s13  ;;  %184 = vrot.lane.b32.xlu0 %v75_v6, %s1274_s29  ;;  %v108_v26 = vand.u32 15, %v82_v15  ;;  %v162_v30 = vsel %vm160_vm1, %v157_v19, %v158_v29  ;;  %v161_v31 = vsel %vm160_vm1, %v158_v29, %v159_v14  ;;  %v1113_v37 = vld [vmem:[#allocation2 + $0x30] ss:$8 sps:$4 sm:$0xff]   ;;  %v1114_v39 = vld [vmem:[#allocation2 + $0x44] ss:$8 sps:$4 sm:$0xff]  }
  0x3c   :  { %v174_v32 = vsel %vm173_vm0, %v171_v13, %v172_v25  ;;  %v177_v34 = vsel %vm173_vm0, %v172_v25, %v169_v9  ;;  %v1116_v40 = vld [vmem:[#allocation2 + $0x40] ss:$8 sps:$4 sm:$0xff]   ;;  %v1117_v41 = vld [vmem:[#allocation2 + $0x54] ss:$8 sps:$4 sm:$0xff]   ;;  %v1119_v42 = vld [vmem:[#allocation2 + $0x50] ss:$8 sps:$4 sm:$0xff]  }
  0x3d   :  { %vm1401_vm2 = vcmp.ne.s32.totalorder %v94_v3, 15  ;;  %vm1426_vm3 = vcmp.ne.s32.totalorder %v108_v26, 15  ;;  %302 = vmatpush1.bf16.msra.mxu0 %v1107_v27  ;;  %v1120_v43 = vld [vmem:[#allocation2 + $0x64] ss:$8 sps:$4 sm:$0xff]   ;;  %v1122_v44 = vld [vmem:[#allocation2 + $0x60] ss:$8 sps:$4 sm:$0xff]  }
  0x3e   :  { %v179_v23 = vsel %vm1401_vm2, %v175_v20, 0.0  ;;  %303 = vmatprep.subr.bf16.mxu0 %v1108_v28  ;;  %v181_v38 = vsel %vm1426_vm3, %v177_v34, 0.0  ;;  %v1123_v45 = vld [vmem:[#allocation2 + $0x74] ss:$8 sps:$4 sm:$0xff]   ;;  %v1125_v46 = vld [vmem:[#allocation2 + $0x70] ss:$8 sps:$4 sm:$0xff]  }
  0x3f   :  { %196 = vrot.lane.b32.xlu1 %v179_v23, %s1275_s13  ;;  %186 = vrot.lane.b32.xlu0 %v76_v7, %s1274_s29  ;;  %v87_v47 = vand.u32 15, %v1381_v1  ;;  %v81_v49 = vadd.s32 16, %v1381_v1  ;;  %v1126_v10 = vld [vmem:[#allocation4 + $0x4] ss:$8 sps:$4 sm:$0xff]   ;;  %v1129_v13 = vld [vmem:[#allocation4 + $0x14] ss:$8 sps:$4 sm:$0xff]  }
  0x40   :  { %518 = vmatprep.subr.bf16.mxu1 %v1126_v10  ;;  %v1131_v14 = vld [vmem:[#allocation4 + $0x10] ss:$8 sps:$4 sm:$0xff]   ;;  %v1132_v15 = vld [vmem:[#allocation4 + $0x24] ss:$8 sps:$4 sm:$0xff]   ;;  %v1134_v16 = vld [vmem:[#allocation4 + $0x20] ss:$8 sps:$4 sm:$0xff]  }
  0x41   :  { %304 = vmatpush1.bf16.msra.mxu0 %v1110_v35  ;;  %vm1438_vm4 = vcmp.ne.s32.totalorder %v87_v47, 0  ;;  %v101_v52 = vand.u32 15, %v81_v49  ;;  %v1135_v17 = vld [vmem:[#allocation4 + $0x34] ss:$8 sps:$4 sm:$0xff]   ;;  %v1137_v18 = vld [vmem:[#allocation4 + $0x30] ss:$8 sps:$4 sm:$0xff]  }
  0x42   :  { %305 = vmatprep.subr.bf16.mxu0 %v1111_v36  ;;  %v165_v51 = vsel %vm1438_vm4, %v164_v22, 0.0  ;;  %v1138_v19 = vld [vmem:[#allocation4 + $0x44] ss:$8 sps:$4 sm:$0xff]   ;;  %v1454_v20 = vsub.s32 0, %v1381_v1  ;;  %v1140_v21 = vld [vmem:[#allocation4 + $0x40] ss:$8 sps:$4 sm:$0xff]  }
  0x43   :  { %188 = vrot.lane.b32.xlu1 %v77_v11, %s1274_s29  ;;  %198 = vrot.lane.b32.xlu0 %v174_v32, %s1275_s13  ;;  %vm1445_vm5 = vcmp.ne.s32.totalorder %v101_v52, 0  ;;  %v1128_v11 = vld [vmem:[#allocation4] ss:$8 sps:$4 sm:$0xff]   ;;  %v1460_v23 = vsub.s32 1, %v1381_v1  ;;  %v1143_v26 = vld [vmem:[#allocation4 + $0x50] ss:$8 sps:$4 sm:$0xff]  }
  0x44   :  { %v167_v62 = vsel %vm1445_vm5, %v162_v30, 0.0  ;;  %519 = vmatpush1.bf16.msra.mxu1 %v1128_v11  ;;  %v155_v22 = vld [vmem:[%s1637_s2] sm:$0x3]  ;;  %v1144_v28 = vld [vmem:[#allocation4 + $0x64] ss:$8 sps:$4 sm:$0xff]   ;;  %s1276_s2 = smov 16  }
  0x45   :  { %306 = vmatpush1.bf16.msra.mxu0 %v1113_v37  ;;  %520 = vmatprep.subr.bf16.mxu1 %v1129_v13  ;;  %v212_v25 = vrot.slane %v155_v22, %v1454_v20  ;;  %v216_v27 = vrot.slane %v155_v22, %v1460_v23  ;;  %v1146_v32 = vld [vmem:[#allocation4 + $0x60] ss:$8 sps:$4 sm:$0xff]   ;;  %s1277_s10 = smov 32  }
  0x46   :  { %307 = vmatprep.subr.bf16.mxu0 %v1114_v39 }
  0x47   :  { %200 = vrot.lane.b32.xlu1 %v181_v38, %s1275_s13 }
  0x48   :  { %521 = vmatpush1.bf16.msra.mxu1 %v1131_v14 }
  0x49   :  { %308 = vmatpush1.bf16.msra.mxu0 %v1116_v40  ;;  %522 = vmatprep.subr.bf16.mxu1 %v1132_v15  ;;  %v1147_v40 = vld [vmem:[#allocation4 + $0x74] ss:$8 sps:$4 sm:$0xff]  }
  0x4a   :  { %309 = vmatprep.subr.bf16.mxu0 %v1117_v41 }
  0x4c   :  { %523 = vmatpush1.bf16.msra.mxu1 %v1134_v16 }
  0x4d   :  { %310 = vmatpush1.bf16.msra.mxu0 %v1119_v42  ;;  %524 = vmatprep.subr.bf16.mxu1 %v1135_v17 }
  0x4e   :  { %311 = vmatprep.subr.bf16.mxu0 %v1120_v43  ;;  %v1149_v43 = vld [vmem:[#allocation4 + $0x70] ss:$8 sps:$4 sm:$0xff]  }
  0x50   :  { %525 = vmatpush1.bf16.msra.mxu1 %v1137_v18 }
  0x51   :  { %312 = vmatpush1.bf16.msra.mxu0 %v1122_v44  ;;  %526 = vmatprep.subr.bf16.mxu1 %v1138_v19 }
  0x52   :  { %313 = vmatprep.subr.bf16.mxu0 %v1123_v45 }
  0x54   :  { %527 = vmatpush1.bf16.msra.mxu1 %v1140_v21 }
  0x55   :  { %314 = vmatpush1.bf16.msra.mxu0 %v1125_v46 }
  0xa9   :  { %v183_v50 = vpop.permute.xlu0 %182 }
  0xaa   :  { %v190_v54 = vadd.f32 %v183_v50, %v165_v51 }
  0xad   :  { %v195_v53 = vpop.permute.xlu1 %194  ;;  %v185_v55 = vpop.permute.xlu0 %184 }
  0xae   :  { %v191_v56 = vadd.f32 %v185_v55, %v163_v24  ;;  %v202_v59 = vadd.f32 %v195_v53, %v190_v54  ;;  %v1141_v24 = vld [vmem:[#allocation4 + $0x54] ss:$8 sps:$4 sm:$0xff]  }
  0xaf   :  { %528 = vmatprep.subr.bf16.mxu1 %v1141_v24 }
  0xb0   :  { %529 = vmatpush1.bf16.msra.mxu1 %v1143_v26 }
  0xb1   :  { %v197_v58 = vpop.permute.xlu1 %196  ;;  %v187_v61 = vpop.permute.xlu0 %186  ;;  %530 = vmatprep.subr.bf16.mxu1 %v1144_v28 }
  0xb2   :  { %v203_v60 = vadd.f32 %v197_v58, %v191_v56  ;;  %v192_v2 = vadd.f32 %v187_v61, %v167_v62 }
  0xb4   :  { %v206_v63 = vpack.c.bf16 %v203_v60, %v202_v59  ;;  %531 = vmatpush1.bf16.msra.mxu1 %v1146_v32 }
  0xb5   :  { %v189_v0 = vpop.permute.xlu1 %188  ;;  %v199_v3 = vpop.permute.xlu0 %198  ;;  %532 = vmatprep.subr.bf16.mxu1 %v1147_v40  ;;  %v1152_v40 = vld [vmem:[#allocation6 + $0x4] ss:$8 sps:$4 sm:$0xff]  }
  0xb6   :  { %332 = vmatmul.mubr.bf16.vlgmr.msra.gmra.mrb[0].mxu0 %v206_v63  ;;  %v193_v5 = vadd.f32 %v189_v0, %v161_v31  ;;  %v204_v7 = vadd.f32 %v199_v3, %v192_v2  ;;  %737 = vmatprep.subr.bf16.mxu0 %v1152_v40 }
  0xb7   :  { %341 = vmatprep.mubr.bf16.mxu0 %v1273_v4 }
  0xb8   :  { %533 = vmatpush1.bf16.msra.mxu1 %v1149_v43  ;;  %v1158_v43 = vld [vmem:[#allocation6 + $0x24] ss:$8 sps:$4 sm:$0xff]  }
  0xb9   :  { %v201_v6 = vpop.permute.xlu1 %200 }
  0xba   :  { %v205_v8 = vadd.f32 %v201_v6, %v193_v5 }
  0xbc   :  { %v207_v9 = vpack.c.bf16 %v205_v8, %v204_v7 }
  0xbe   :  { %342 = vmatmul.mubr.bf16.gmra.mrb[4].mxu0 %v207_v9 }
  0xbf   :  { %769 = vmatprep.mubr.bf16.mxu0 %v1273_v4 }
 0x189   :  { %v333_v29 = vpop.f32.mrb[0].mxu0 }
 0x18a   :  { %v334_v30 = vadd.f32 %v333_v29, %v212_v25  ;;  %v335_v31 = vpop.f32.mrb[1].mxu0 }
 0x18b   :  { %v336_v34 = vadd.f32 %v335_v31, %v216_v27  ;;  %v337_v35 = vpop.f32.mrb[2].mxu0 }
 0x18c   :  { %v352_v36 = vmax.f32 %v334_v30, 0.0  ;;  %v338_v37 = vadd.f32 %v337_v35, %v212_v25  ;;  %v339_v38 = vpop.f32.mrb[3].mxu0 }
 0x18d   :  { %v340_v39 = vadd.f32 %v339_v38, %v216_v27 }
 0x18e   :  { %v356_v41 = vadd.f32 %v352_v36, %v336_v34  ;;  %v353_v42 = vmax.f32 %v338_v37, 0.0 }
 0x190   :  { %v357_v44 = vadd.f32 %v353_v42, %v340_v39  ;;  %401 = vrot.lane.b32.xlu0 %v356_v41, %s1276_s2  ;;  %v389_v46 = vrot.slane %v356_v41, 1  ;;  %v377_v51 = vrot.slane %v356_v41, 7  ;;  %v1150_v39 = vld [vmem:[#allocation6] ss:$8 sps:$4 sm:$0xff]   ;;  %v1155_v41 = vld [vmem:[#allocation6 + $0x14] ss:$8 sps:$4 sm:$0xff]  }
 0x191   :  { %v343_v45 = vpop.f32.mrb[4].mxu0  ;;  %738 = vmatpush1.bf16.msra.mxu0 %v1150_v39  ;;  %v1153_v42 = vld [vmem:[#allocation6 + $0x10] ss:$8 sps:$4 sm:$0xff]  }
 0x192   :  { %v344_v47 = vadd.f32 %v343_v45, %v212_v25  ;;  %v345_v49 = vpop.f32.mrb[5].mxu0  ;;  %403 = vrot.lane.b32.xlu1 %v357_v44, %s1276_s2  ;;  %v390_v50 = vrot.slane %v357_v44, 1  ;;  %v378_v52 = vrot.slane %v357_v44, 7  ;;  %739 = vmatprep.subr.bf16.mxu0 %v1155_v41  ;;  %v1156_v44 = vld [vmem:[#allocation6 + $0x20] ss:$8 sps:$4 sm:$0xff]  }
 0x193   :  { %v346_v53 = vadd.f32 %v345_v49, %v216_v27  ;;  %v347_v54 = vpop.f32.mrb[6].mxu0  ;;  %v1161_v45 = vld [vmem:[#allocation6 + $0x34] ss:$8 sps:$4 sm:$0xff]   ;;  %v1162_v49 = vld [vmem:[#allocation6 + $0x40] ss:$8 sps:$4 sm:$0xff]  }
 0x194   :  { %v354_v55 = vmax.f32 %v344_v47, 0.0  ;;  %v348_v56 = vadd.f32 %v347_v54, %v212_v25  ;;  %v349_v58 = vpop.f32.mrb[7].mxu0  ;;  %v395_v59 = vsel %vm173_vm0, %v389_v46, %v390_v50  ;;  %v383_v60 = vsel %vm160_vm1, %v377_v51, %v378_v52  ;;  %v1164_v47 = vld [vmem:[#allocation6 + $0x44] ss:$8 sps:$4 sm:$0xff]  }
 0x195   :  { %v350_v61 = vadd.f32 %v349_v58, %v216_v27  ;;  %413 = vrot.lane.b32.xlu0 %v395_v59, %s1277_s10  ;;  %740 = vmatpush1.bf16.msra.mxu0 %v1153_v42 }
 0x196   :  { %v358_v62 = vadd.f32 %v354_v55, %v346_v53  ;;  %v355_v63 = vmax.f32 %v348_v56, 0.0  ;;  %741 = vmatprep.subr.bf16.mxu0 %v1158_v43  ;;  %v1168_v55 = vld [vmem:[#allocation6 + $0x60] ss:$8 sps:$4 sm:$0xff]   ;;  %v1170_v56 = vld [vmem:[#allocation6 + $0x64] ss:$8 sps:$4 sm:$0xff]  }
 0x198   :  { %v391_v0 = vrot.slane %v358_v62, 1  ;;  %v359_v2 = vadd.f32 %v355_v63, %v350_v61  ;;  %v379_v3 = vrot.slane %v358_v62, 7 }
 0x199   :  { %405 = vrot.lane.b32.xlu0 %v358_v62, %s1276_s2  ;;  %742 = vmatpush1.bf16.msra.mxu0 %v1156_v44 }
 0x19a   :  { %v394_v5 = vsel %vm173_vm0, %v390_v50, %v391_v0  ;;  %v392_v6 = vrot.slane %v359_v2, 1  ;;  %v380_v7 = vrot.slane %v359_v2, 7  ;;  %v382_v8 = vsel %vm160_vm1, %v378_v52, %v379_v3  ;;  %743 = vmatprep.subr.bf16.mxu0 %v1161_v45  ;;  %v376_v50 = vld [vmem:[%s1639_s4] sm:$0x3]  ;;  %v1167_v52 = vld [vmem:[#allocation6 + $0x54] ss:$8 sps:$4 sm:$0xff]  }
 0x19b   :  { %v398_v9 = vsel %vm1401_vm2, %v394_v5, 0.0  ;;  %v387_v30 = vsel %vm1445_vm5, %v382_v8, 0.0  ;;  %v431_v53 = vrot.slane %v376_v50, %v1454_v20  ;;  %v435_v54 = vrot.slane %v376_v50, %v1460_v23  ;;  %v1173_v5 = vld [vmem:[#allocation6 + $0x74] ss:$8 sps:$4 sm:$0xff]   ;;  %v1171_v8 = vld [vmem:[#allocation6 + $0x70] ss:$8 sps:$4 sm:$0xff]  }
 0x19c   :  { %415 = vrot.lane.b32.xlu1 %v398_v9, %s1277_s10  ;;  %v393_v10 = vsel %vm173_vm0, %v391_v0, %v392_v6  ;;  %v396_v11 = vsel %vm173_vm0, %v392_v6, %v389_v46  ;;  %v384_v13 = vsel %vm160_vm1, %v380_v7, %v377_v51  ;;  %v381_v14 = vsel %vm160_vm1, %v379_v3, %v380_v7  ;;  %v1159_v46 = vld [vmem:[#allocation6 + $0x30] ss:$8 sps:$4 sm:$0xff]   ;;  %s1278_s4 = smov 64  }
 0x19d   :  { %417 = vrot.lane.b32.xlu0 %v393_v10, %s1277_s10  ;;  %v400_v15 = vsel %vm1426_vm3, %v396_v11, 0.0  ;;  %v385_v19 = vsel %vm1438_vm4, %v384_v13, 0.0  ;;  %744 = vmatpush1.bf16.msra.mxu0 %v1159_v46  ;;  %v1165_v51 = vld [vmem:[#allocation6 + $0x50] ss:$8 sps:$4 sm:$0xff]  }
 0x19e   :  { %745 = vmatprep.subr.bf16.mxu0 %v1164_v47 }
 0x1a0   :  { %407 = vrot.lane.b32.xlu1 %v359_v2, %s1276_s2 }
 0x1a1   :  { %746 = vmatpush1.bf16.msra.mxu0 %v1162_v49 }
 0x1a2   :  { %747 = vmatprep.subr.bf16.mxu0 %v1167_v52 }
 0x1a4   :  { %419 = vrot.lane.b32.xlu1 %v400_v15, %s1277_s10 }
 0x1a5   :  { %748 = vmatpush1.bf16.msra.mxu0 %v1165_v51 }
 0x1a6   :  { %749 = vmatprep.subr.bf16.mxu0 %v1170_v56 }
 0x1a9   :  { %750 = vmatpush1.bf16.msra.mxu0 %v1168_v55 }
 0x1aa   :  { %751 = vmatprep.subr.bf16.mxu0 %v1173_v5  ;;  %v1176_v5 = vld [vmem:[%s1642_s7 + $0x4] ss:$8 sps:$4 sm:$0xff]  }
 0x1ab   :  { %956 = vmatprep.subr.bf16.mxu1 %v1176_v5 }
 0x1ad   :  { %752 = vmatpush1.bf16.msra.mxu0 %v1171_v8  ;;  %v1182_v8 = vld [vmem:[%s1642_s7 + $0x24] ss:$8 sps:$4 sm:$0xff]  }
 0x202   :  { %v402_v16 = vpop.permute.xlu0 %401 }
 0x203   :  { %v409_v21 = vadd.f32 %v402_v16, %v385_v19 }
 0x204   :  { %v404_v18 = vpop.permute.xlu1 %403 }
 0x205   :  { %v410_v22 = vadd.f32 %v404_v18, %v383_v60 }
 0x207   :  { %v414_v17 = vpop.permute.xlu0 %413 }
 0x208   :  { %v421_v26 = vadd.f32 %v414_v17, %v409_v21 }
 0x20b   :  { %v406_v24 = vpop.permute.xlu0 %405 }
 0x20c   :  { %v411_v32 = vadd.f32 %v406_v24, %v387_v30 }
 0x20e   :  { %v416_v25 = vpop.permute.xlu1 %415 }
 0x20f   :  { %v422_v27 = vadd.f32 %v416_v25, %v410_v22  ;;  %v418_v31 = vpop.permute.xlu0 %417 }
 0x210   :  { %v423_v36 = vadd.f32 %v418_v31, %v411_v32 }
 0x211   :  { %v425_v28 = vpack.c.bf16 %v422_v27, %v421_v26 }
 0x212   :  { %v408_v29 = vpop.permute.xlu1 %407 }
 0x213   :  { %551 = vmatmul.mubr.bf16.vlgmr.msra.gmra.mrb[0].mxu1 %v425_v28  ;;  %v412_v34 = vadd.f32 %v408_v29, %v381_v14 }
 0x214   :  { %560 = vmatprep.mubr.bf16.mxu1 %v1273_v4 }
 0x216   :  { %v420_v35 = vpop.permute.xlu1 %419 }
 0x217   :  { %v424_v37 = vadd.f32 %v420_v35, %v412_v34 }
 0x219   :  { %v426_v38 = vpack.c.bf16 %v424_v37, %v423_v36 }
 0x21b   :  { %561 = vmatmul.mubr.bf16.gmra.mrb[4].mxu1 %v426_v38 }
 0x21c   :  { %988 = vmatprep.mubr.bf16.mxu1 %v1273_v4 }
 0x2e6   :  { %v552_v58 = vpop.f32.mrb[0].mxu1 }
 0x2e7   :  { %v553_v59 = vadd.f32 %v552_v58, %v431_v53  ;;  %v554_v60 = vpop.f32.mrb[1].mxu1 }
 0x2e8   :  { %v555_v61 = vadd.f32 %v554_v60, %v435_v54  ;;  %v556_v62 = vpop.f32.mrb[2].mxu1 }
 0x2e9   :  { %v571_v63 = vmax.f32 %v553_v59, 0.0  ;;  %v557_v0 = vadd.f32 %v556_v62, %v431_v53  ;;  %v558_v2 = vpop.f32.mrb[3].mxu1 }
 0x2ea   :  { %v559_v3 = vadd.f32 %v558_v2, %v435_v54 }
 0x2eb   :  { %v575_v6 = vadd.f32 %v571_v63, %v555_v61  ;;  %v572_v7 = vmax.f32 %v557_v0, 0.0 }
 0x2ed   :  { %v576_v9 = vadd.f32 %v572_v7, %v559_v3  ;;  %620 = vrot.lane.b32.xlu0 %v575_v6, %s1277_s10  ;;  %v608_v11 = vrot.slane %v575_v6, 1  ;;  %v596_v16 = vrot.slane %v575_v6, 7  ;;  %v1174_v3 = vld [vmem:[%s1642_s7] ss:$8 sps:$4 sm:$0xff]   ;;  %v1179_v6 = vld [vmem:[%s1642_s7 + $0x14] ss:$8 sps:$4 sm:$0xff]  }
 0x2ee   :  { %v562_v10 = vpop.f32.mrb[4].mxu1  ;;  %957 = vmatpush1.bf16.msra.mxu1 %v1174_v3  ;;  %v1177_v7 = vld [vmem:[%s1642_s7 + $0x10] ss:$8 sps:$4 sm:$0xff]  }
 0x2ef   :  { %v563_v13 = vadd.f32 %v562_v10, %v431_v53  ;;  %v564_v14 = vpop.f32.mrb[5].mxu1  ;;  %622 = vrot.lane.b32.xlu1 %v576_v9, %s1277_s10  ;;  %v609_v15 = vrot.slane %v576_v9, 1  ;;  %v597_v17 = vrot.slane %v576_v9, 7  ;;  %958 = vmatprep.subr.bf16.mxu1 %v1179_v6  ;;  %v1180_v9 = vld [vmem:[%s1642_s7 + $0x20] ss:$8 sps:$4 sm:$0xff]  }
 0x2f0   :  { %v565_v18 = vadd.f32 %v564_v14, %v435_v54  ;;  %v566_v19 = vpop.f32.mrb[6].mxu1  ;;  %v1185_v10 = vld [vmem:[%s1642_s7 + $0x34] ss:$8 sps:$4 sm:$0xff]   ;;  %v1186_v14 = vld [vmem:[%s1642_s7 + $0x40] ss:$8 sps:$4 sm:$0xff]  }
 0x2f1   :  { %v573_v21 = vmax.f32 %v563_v13, 0.0  ;;  %v567_v22 = vadd.f32 %v566_v19, %v431_v53  ;;  %v568_v24 = vpop.f32.mrb[7].mxu1  ;;  %v614_v25 = vsel %vm173_vm0, %v608_v11, %v609_v15  ;;  %v602_v26 = vsel %vm160_vm1, %v596_v16, %v597_v17  ;;  %v1188_v13 = vld [vmem:[%s1642_s7 + $0x44] ss:$8 sps:$4 sm:$0xff]  }
 0x2f2   :  { %v569_v27 = vadd.f32 %v568_v24, %v435_v54  ;;  %632 = vrot.lane.b32.xlu0 %v614_v25, %s1278_s4  ;;  %959 = vmatpush1.bf16.msra.mxu1 %v1177_v7 }
 0x2f3   :  { %v577_v28 = vadd.f32 %v573_v21, %v565_v18  ;;  %v574_v29 = vmax.f32 %v567_v22, 0.0  ;;  %960 = vmatprep.subr.bf16.mxu1 %v1182_v8  ;;  %v1192_v21 = vld [vmem:[%s1642_s7 + $0x60] ss:$8 sps:$4 sm:$0xff]   ;;  %v1194_v22 = vld [vmem:[%s1642_s7 + $0x64] ss:$8 sps:$4 sm:$0xff]  }
 0x2f5   :  { %v610_v30 = vrot.slane %v577_v28, 1  ;;  %v578_v31 = vadd.f32 %v574_v29, %v569_v27  ;;  %v598_v32 = vrot.slane %v577_v28, 7 }
 0x2f6   :  { %624 = vrot.lane.b32.xlu0 %v577_v28, %s1277_s10  ;;  %961 = vmatpush1.bf16.msra.mxu1 %v1180_v9 }
 0x2f7   :  { %v613_v34 = vsel %vm173_vm0, %v609_v15, %v610_v30  ;;  %v611_v35 = vrot.slane %v578_v31, 1  ;;  %v599_v36 = vrot.slane %v578_v31, 7  ;;  %v601_v37 = vsel %vm160_vm1, %v597_v17, %v598_v32  ;;  %962 = vmatprep.subr.bf16.mxu1 %v1185_v10  ;;  %v595_v15 = vld [vmem:[%s1641_s6] sm:$0x3]  ;;  %v1191_v17 = vld [vmem:[%s1642_s7 + $0x54] ss:$8 sps:$4 sm:$0xff]  }
 0x2f8   :  { %v617_v38 = vsel %vm1401_vm2, %v613_v34, 0.0  ;;  %v606_v58 = vsel %vm1445_vm5, %v601_v37, 0.0  ;;  %v650_v18 = vrot.slane %v595_v15, %v1454_v20  ;;  %v654_v19 = vrot.slane %v595_v15, %v1460_v23  ;;  %v1197_v34 = vld [vmem:[%s1642_s7 + $0x74] ss:$8 sps:$4 sm:$0xff]   ;;  %v1195_v37 = vld [vmem:[%s1642_s7 + $0x70] ss:$8 sps:$4 sm:$0xff]  }
 0x2f9   :  { %634 = vrot.lane.b32.xlu1 %v617_v38, %s1278_s4  ;;  %v612_v39 = vsel %vm173_vm0, %v610_v30, %v611_v35  ;;  %v615_v40 = vsel %vm173_vm0, %v611_v35, %v608_v11  ;;  %v603_v41 = vsel %vm160_vm1, %v599_v36, %v596_v16  ;;  %v600_v42 = vsel %vm160_vm1, %v598_v32, %v599_v36  ;;  %v1183_v11 = vld [vmem:[%s1642_s7 + $0x30] ss:$8 sps:$4 sm:$0xff]  }
 0x2fa   :  { %636 = vrot.lane.b32.xlu0 %v612_v39, %s1278_s4  ;;  %v619_v43 = vsel %vm1426_vm3, %v615_v40, 0.0  ;;  %v604_v47 = vsel %vm1438_vm4, %v603_v41, 0.0  ;;  %963 = vmatpush1.bf16.msra.mxu1 %v1183_v11  ;;  %v1189_v16 = vld [vmem:[%s1642_s7 + $0x50] ss:$8 sps:$4 sm:$0xff]  }
 0x2fb   :  { %964 = vmatprep.subr.bf16.mxu1 %v1188_v13 }
 0x2fd   :  { %626 = vrot.lane.b32.xlu1 %v578_v31, %s1277_s10 }
 0x2fe   :  { %965 = vmatpush1.bf16.msra.mxu1 %v1186_v14 }
 0x2ff   :  { %966 = vmatprep.subr.bf16.mxu1 %v1191_v17 }
 0x301   :  { %638 = vrot.lane.b32.xlu1 %v619_v43, %s1278_s4 }
 0x302   :  { %967 = vmatpush1.bf16.msra.mxu1 %v1189_v16 }
 0x303   :  { %968 = vmatprep.subr.bf16.mxu1 %v1194_v22 }
 0x306   :  { %969 = vmatpush1.bf16.msra.mxu1 %v1192_v21 }
 0x307   :  { %970 = vmatprep.subr.bf16.mxu1 %v1197_v34 }
 0x30a   :  { %971 = vmatpush1.bf16.msra.mxu1 %v1195_v37 }
 0x35f   :  { %v621_v44 = vpop.permute.xlu0 %620 }
 0x360   :  { %v628_v49 = vadd.f32 %v621_v44, %v604_v47 }
 0x361   :  { %v623_v46 = vpop.permute.xlu1 %622 }
 0x362   :  { %v629_v50 = vadd.f32 %v623_v46, %v602_v26 }
 0x364   :  { %v633_v45 = vpop.permute.xlu0 %632 }
 0x365   :  { %v640_v53 = vadd.f32 %v633_v45, %v628_v49 }
 0x368   :  { %v625_v51 = vpop.permute.xlu0 %624 }
 0x369   :  { %v630_v60 = vadd.f32 %v625_v51, %v606_v58 }
 0x36b   :  { %v635_v52 = vpop.permute.xlu1 %634 }
 0x36c   :  { %v641_v54 = vadd.f32 %v635_v52, %v629_v50  ;;  %v637_v59 = vpop.permute.xlu0 %636 }
 0x36d   :  { %v642_v63 = vadd.f32 %v637_v59, %v630_v60 }
 0x36e   :  { %v644_v55 = vpack.c.bf16 %v641_v54, %v640_v53 }
 0x36f   :  { %v627_v56 = vpop.permute.xlu1 %626 }
 0x370   :  { %770 = vmatmul.mubr.bf16.vlgmr.msra.gmra.mrb[8].mxu0 %v644_v55  ;;  %v631_v61 = vadd.f32 %v627_v56, %v600_v42 }
 0x371   :  { %779 = vmatprep.mubr.bf16.mxu0 %v1273_v4 }
 0x373   :  { %v639_v62 = vpop.permute.xlu1 %638 }
 0x374   :  { %v643_v0 = vadd.f32 %v639_v62, %v631_v61 }
 0x376   :  { %v645_v2 = vpack.c.bf16 %v643_v0, %v642_v63 }
 0x378   :  { %780 = vmatmul.mubr.bf16.gmra.mrb[12].mxu0 %v645_v2 }
 0x443   :  { %v771_v24 = vpop.f32.mrb[8].mxu0 }
 0x444   :  { %v772_v25 = vadd.f32 %v771_v24, %v650_v18  ;;  %v773_v26 = vpop.f32.mrb[9].mxu0 }
 0x445   :  { %v774_v27 = vadd.f32 %v773_v26, %v654_v19  ;;  %v775_v28 = vpop.f32.mrb[10].mxu0 }
 0x446   :  { %v790_v29 = vmax.f32 %v772_v25, 0.0  ;;  %v776_v30 = vadd.f32 %v775_v28, %v650_v18  ;;  %v777_v31 = vpop.f32.mrb[11].mxu0  ;;  %v814_v28 = vld [vmem:[%s1643_s8] sm:$0x3] }
 0x447   :  { %v778_v32 = vadd.f32 %v777_v31, %v654_v19 }
 0x448   :  { %v794_v35 = vadd.f32 %v790_v29, %v774_v27  ;;  %v791_v36 = vmax.f32 %v776_v30, 0.0  ;;  %v869_v29 = vrot.slane %v814_v28, %v1454_v20  ;;  %v873_v30 = vrot.slane %v814_v28, %v1460_v23 }
 0x44a   :  { %v795_v38 = vadd.f32 %v791_v36, %v778_v32  ;;  %839 = vrot.lane.b32.xlu0 %v794_v35, %s1276_s2  ;;  %v827_v40 = vrot.slane %v794_v35, 1  ;;  %v815_v44 = vrot.slane %v794_v35, 7 }
 0x44b   :  { %v781_v39 = vpop.f32.mrb[12].mxu0 }
 0x44c   :  { %v782_v41 = vadd.f32 %v781_v39, %v650_v18  ;;  %v783_v42 = vpop.f32.mrb[13].mxu0  ;;  %841 = vrot.lane.b32.xlu1 %v795_v38, %s1276_s2  ;;  %v828_v43 = vrot.slane %v795_v38, 1  ;;  %v816_v45 = vrot.slane %v795_v38, 7 }
 0x44d   :  { %v784_v46 = vadd.f32 %v783_v42, %v654_v19  ;;  %v785_v47 = vpop.f32.mrb[14].mxu0 }
 0x44e   :  { %v792_v49 = vmax.f32 %v782_v41, 0.0  ;;  %v786_v50 = vadd.f32 %v785_v47, %v650_v18  ;;  %v787_v51 = vpop.f32.mrb[15].mxu0  ;;  %v833_v52 = vsel %vm173_vm0, %v827_v40, %v828_v43  ;;  %v821_v53 = vsel %vm160_vm1, %v815_v44, %v816_v45 }
 0x44f   :  { %v788_v54 = vadd.f32 %v787_v51, %v654_v19  ;;  %851 = vrot.lane.b32.xlu0 %v833_v52, %s1277_s10 }
 0x450   :  { %v796_v55 = vadd.f32 %v792_v49, %v784_v46  ;;  %v793_v56 = vmax.f32 %v786_v50, 0.0 }
 0x452   :  { %v829_v58 = vrot.slane %v796_v55, 1  ;;  %v797_v59 = vadd.f32 %v793_v56, %v788_v54  ;;  %v817_v60 = vrot.slane %v796_v55, 7 }
 0x453   :  { %843 = vrot.lane.b32.xlu0 %v796_v55, %s1276_s2 }
 0x454   :  { %v832_v61 = vsel %vm173_vm0, %v828_v43, %v829_v58  ;;  %v830_v62 = vrot.slane %v797_v59, 1  ;;  %v818_v63 = vrot.slane %v797_v59, 7  ;;  %v820_v0 = vsel %vm160_vm1, %v816_v45, %v817_v60 }
 0x455   :  { %v836_v2 = vsel %vm1401_vm2, %v832_v61, 0.0  ;;  %v825_v33 = vsel %vm1445_vm5, %v820_v0, 0.0 }
 0x456   :  { %853 = vrot.lane.b32.xlu1 %v836_v2, %s1277_s10  ;;  %v831_v3 = vsel %vm173_vm0, %v829_v58, %v830_v62  ;;  %v834_v5 = vsel %vm173_vm0, %v830_v62, %v827_v40  ;;  %v822_v6 = vsel %vm160_vm1, %v818_v63, %v815_v44  ;;  %v819_v7 = vsel %vm160_vm1, %v817_v60, %v818_v63 }
 0x457   :  { %855 = vrot.lane.b32.xlu0 %v831_v3, %s1277_s10  ;;  %v838_v12 = vsel %vm1426_vm3, %v834_v5, 0.0  ;;  %v823_v11 = vsel %vm1438_vm4, %v822_v6, 0.0 }
 0x45a   :  { %845 = vrot.lane.b32.xlu1 %v797_v59, %s1276_s2 }
 0x45e   :  { %857 = vrot.lane.b32.xlu1 %v838_v12, %s1277_s10 }
 0x4bc   :  { %v840_v8 = vpop.permute.xlu0 %839 }
 0x4bd   :  { %v847_v13 = vadd.f32 %v840_v8, %v823_v11 }
 0x4be   :  { %v842_v10 = vpop.permute.xlu1 %841 }
 0x4bf   :  { %v848_v14 = vadd.f32 %v842_v10, %v821_v53 }
 0x4c1   :  { %v852_v9 = vpop.permute.xlu0 %851 }
 0x4c2   :  { %v859_v16 = vadd.f32 %v852_v9, %v847_v13 }
 0x4c5   :  { %v844_v15 = vpop.permute.xlu0 %843 }
 0x4c6   :  { %v849_v22 = vadd.f32 %v844_v15, %v825_v33 }
 0x4c8   :  { %v854_v1 = vpop.permute.xlu1 %853 }
 0x4c9   :  { %v860_v17 = vadd.f32 %v854_v1, %v848_v14  ;;  %v856_v21 = vpop.permute.xlu0 %855 }
 0x4ca   :  { %v861_v48 = vadd.f32 %v856_v21, %v849_v22 }
 0x4cb   :  { %v863_v18 = vpack.c.bf16 %v860_v17, %v859_v16 }
 0x4cc   :  { %v846_v19 = vpop.permute.xlu1 %845 }
 0x4cd   :  { %989 = vmatmul.mubr.bf16.vlgmr.msra.gmra.mrb[8].mxu1 %v863_v18  ;;  %v850_v24 = vadd.f32 %v846_v19, %v819_v7 }
 0x4ce   :  { %998 = vmatprep.mubr.bf16.mxu1 %v1273_v4 }
 0x4d0   :  { %v858_v25 = vpop.permute.xlu1 %857 }
 0x4d1   :  { %v862_v26 = vadd.f32 %v858_v25, %v850_v24 }
 0x4d3   :  { %v864_v27 = vpack.c.bf16 %v862_v26, %v861_v48 }
 0x4d5   :  { %999 = vmatmul.mubr.bf16.gmra.mrb[12].mxu1 %v864_v27 }
 0x5a0   :  { %v990_v57 = vpop.f32.mrb[8].mxu1 }
 0x5a1   :  { %v991_v31 = vadd.f32 %v990_v57, %v869_v29  ;;  %v992_v32 = vpop.f32.mrb[9].mxu1 }
 0x5a2   :  { %v993_v34 = vadd.f32 %v992_v32, %v873_v30  ;;  %v994_v4 = vpop.f32.mrb[10].mxu1 }
 0x5a3   :  { %v1009_v35 = vmax.f32 %v991_v31, 0.0  ;;  %v995_v36 = vadd.f32 %v994_v4, %v869_v29  ;;  %v996_v37 = vpop.f32.mrb[11].mxu1 }
 0x5a4   :  { %v997_v38 = vadd.f32 %v996_v37, %v873_v30 }
 0x5a5   :  { %v1013_v39 = vadd.f32 %v1009_v35, %v993_v34  ;;  %v1010_v40 = vmax.f32 %v995_v36, 0.0 }
 0x5a7   :  { %1017 = vst [vmem:[%s1644_s9] sm:$0xff] %v1013_v39  ;;  %v1014_v41 = vadd.f32 %v1010_v40, %v997_v38 }
 0x5a8   :  { %v1000_v42 = vpop.f32.mrb[12].mxu1 }
 0x5a9   :  { %1018 = vst [vmem:[%s1644_s9 + $0x8] sm:$0xff] %v1014_v41  ;;  %v1001_v20 = vadd.f32 %v1000_v42, %v869_v29  ;;  %v1002_v23 = vpop.f32.mrb[13].mxu1 }
 0x5aa   :  { %v1003_v43 = vadd.f32 %v1002_v23, %v873_v30  ;;  %v1004_v44 = vpop.f32.mrb[14].mxu1 }
 0x5ab   :  { %v1011_v45 = vmax.f32 %v1001_v20, 0.0  ;;  %v1005_v46 = vadd.f32 %v1004_v44, %v869_v29  ;;  %v1006_v47 = vpop.f32.mrb[15].mxu1 }
 0x5ac   :  { %v1007_v49 = vadd.f32 %v1006_v47, %v873_v30 }
 0x5ad   :  { %v1015_v50 = vadd.f32 %v1011_v45, %v1003_v43  ;;  %v1012_v51 = vmax.f32 %v1005_v46, 0.0 }
 0x5af   :  { %1019 = vst [vmem:[%s1644_s9 + $0x10] sm:$0xff] %v1015_v50  ;;  %v1016_v52 = vadd.f32 %v1012_v51, %v1007_v49 }
 0x5b1   :  { %1020 = vst [vmem:[%s1644_s9 + $0x18] sm:$0xff] %v1016_v52 }
 0x5b2   :  { %1025 = vsyncpa [#allocation3], 1 }
 0x5b3   :  { %1026 = vsyncpa [#allocation5], 1 }

</bundles_post_ra>
